<compile_context>
chip_gen: v7x
topology: tpu7x:2x2x1
jax: 0.10.0
libtpu: 0.0.40
codegen_flags: <defaults>
</compile_context>

<pallas_src>
import jax
import jax.numpy as jnp
from jax.experimental import pallas as pl
from jax.experimental.pallas import tpu as pltpu


def _round_up(x, m):
    return (x + m - 1) // m * m


# ----------------------------------------------------------------------------
# Pallas kernel: full GraphColoringNet forward on one VMEM-resident tile set.
# Matmul inputs are bf16 (MXU), accumulation / bias / ReLU are f32.
# ----------------------------------------------------------------------------
def gcn_net_kernel(a_ref, x_ref, w1_ref, b1_ref, w2_ref, b2_ref,
                   wf_ref, bf_ref, out_ref):
    a = a_ref[...]                                   # (Np, Np)  compute dtype
    x = x_ref[...]                                   # (Np, Fp)  compute dtype

    # conv1: A_hat @ (X @ W1) + b1, then ReLU
    h = jnp.dot(x, w1_ref[...], preferred_element_type=jnp.float32)
    h = jnp.dot(a, h.astype(a.dtype), preferred_element_type=jnp.float32)
    h = jnp.maximum(h + b1_ref[...], 0.0)

    # conv2: A_hat @ (H @ W2) + b2, then ReLU
    h = jnp.dot(h.astype(a.dtype), w2_ref[...], preferred_element_type=jnp.float32)
    h = jnp.dot(a, h.astype(a.dtype), preferred_element_type=jnp.float32)
    h = jnp.maximum(h + b2_ref[...], 0.0)

    # fc: H @ Wf + bf
    out = jnp.dot(h.astype(a.dtype), wf_ref[...], preferred_element_type=jnp.float32)
    out_ref[...] = (out + bf_ref[...]).astype(out_ref.dtype)


def graph_coloring_forward(a_hat, x, params, *, compute_dtype=jnp.bfloat16):
    """Fused GraphColoringNet forward in a single pallas_call (lane-padded)."""
    n_nodes, f_in = x.shape
    hidden = params["w1"].shape[1]
    out_dim = params["wf"].shape[1]

    # Lane/sublane-dense padded sizes (128 covers both the 128-lane and
    # 8-sublane alignment requirements).
    npad = _round_up(n_nodes, 128)
    fpad = _round_up(f_in, 128)
    hpad = _round_up(hidden, 128)
    cpad = _round_up(out_dim, 128)

    def pad2(m, rows, cols):
        return jnp.pad(m, ((0, rows - m.shape[0]), (0, cols - m.shape[1])))

    # bf16 matmul operands, f32 biases.
    a_p = pad2(a_hat, npad, npad).astype(compute_dtype)
    x_p = pad2(x, npad, fpad).astype(compute_dtype)
    w1_p = pad2(params["w1"], fpad, hpad).astype(compute_dtype)
    w2_p = pad2(params["w2"], hpad, hpad).astype(compute_dtype)
    wf_p = pad2(params["wf"], hpad, cpad).astype(compute_dtype)
    b1_p = pad2(params["b1"], 1, hpad).astype(jnp.float32)
    b2_p = pad2(params["b2"], 1, hpad).astype(jnp.float32)
    bf_p = pad2(params["bf"], 1, cpad).astype(jnp.float32)

    # Cost / VMEM bookkeeping (Python ints; advisory only).
    itemsize = jnp.dtype(compute_dtype).itemsize
    bytes_in = ((npad * npad + npad * fpad + fpad * hpad
                 + hpad * hpad + hpad * cpad) * itemsize
                + (hpad + hpad + cpad) * 4)
    bytes_out = npad * cpad * 4
    bytes_tmp = npad * hpad * (2 * 4 + itemsize)          # f32 acc + bf16 copy
    flops = 2 * npad * (fpad * hpad + npad * hpad
                        + hpad * hpad + npad * hpad + hpad * cpad)

    vmem_need = 2 * (bytes_in + bytes_out) + bytes_tmp + (4 << 20)
    vmem_limit = int(min(max(vmem_need, 16 << 20), 64 << 20))

    vmem_spec = pl.BlockSpec(memory_space=pltpu.MemorySpace.VMEM)
    n_inputs = 8

    out_padded = pl.pallas_call(
        gcn_net_kernel,
        out_shape=jax.ShapeDtypeStruct((npad, cpad), jnp.float32),
        in_specs=[vmem_spec] * n_inputs,
        out_specs=vmem_spec,
        compiler_params=pltpu.CompilerParams(vmem_limit_bytes=vmem_limit),
        cost_estimate=pl.CostEstimate(flops=flops, transcendentals=0,
                                      bytes_accessed=bytes_in + bytes_out),
    )(a_p, x_p, w1_p, b1_p, w2_p, b2_p, wf_p, bf_p)

    # Slice back to the logical shape.
    return out_padded[:n_nodes, :out_dim]


# ----------------------------------------------------------------------------
# Glue: normalized adjacency from edge_index, deterministic parameter init,
# and a pure-JAX f32 reference for a sanity check.
# ----------------------------------------------------------------------------
def build_normalized_adjacency(edge_index, num_nodes):
    """A_hat = D^-1/2 (A + I) D^-1/2, with A[dst, src] = 1 (message src -> dst)."""
    src, dst = edge_index[0], edge_index[1]
    adj = jnp.zeros((num_nodes, num_nodes), dtype=jnp.float32)
    adj = adj.at[dst, src].set(1.0)
    adj = adj + jnp.eye(num_nodes, dtype=jnp.float32)      # self loops
    deg = jnp.sum(adj, axis=1)
    dinv_sqrt = jnp.where(deg > 0, 1.0 / jnp.sqrt(deg), 0.0)
    return dinv_sqrt[:, None] * adj * dinv_sqrt[None, :]


def init_params(key, input_dim, hidden_dim, output_dim):
    k1, k2, k3 = jax.random.split(key, 3)

    def glorot(k, shape):
        fan_in, fan_out = shape
        lim = jnp.sqrt(6.0 / (fan_in + fan_out))
        return jax.random.uniform(k, shape, jnp.float32, -lim, lim)

    return {
        "w1": glorot(k1, (input_dim, hidden_dim)),
        "b1": jnp.zeros((1, hidden_dim), jnp.float32),
        "w2": glorot(k2, (hidden_dim, hidden_dim)),
        "b2": jnp.zeros((1, hidden_dim), jnp.float32),
        "wf": glorot(k3, (hidden_dim, output_dim)),
        "bf": jnp.zeros((1, output_dim), jnp.float32),
    }


def reference_forward(a_hat, x, params):
    h = jnp.maximum(a_hat @ (x @ params["w1"]) + params["b1"], 0.0)
    h = jnp.maximum(a_hat @ (h @ params["w2"]) + params["b2"], 0.0)
    return h @ params["wf"] + params["bf"]


if __name__ == "__main__":
    # Small, module-consistent shapes: 16 graph nodes, 8 input features,
    # hidden_dim=32, output_dim=4 colors.
    num_nodes, input_dim, hidden_dim, output_dim = 16, 8, 32, 4

    key = jax.random.PRNGKey(0)
    kx, kp = jax.random.split(key)

    # Node features.
    x = jax.random.normal(kx, (num_nodes, input_dim), dtype=jnp.float32)

    # Deterministic undirected graph: ring + a few chords, both directions.
    ring_src = jnp.arange(num_nodes, dtype=jnp.int32)
    ring_dst = (ring_src + 1) % num_nodes
    chord_src = jnp.array([0, 2, 4, 6, 8, 10, 12, 14], dtype=jnp.int32)
    chord_dst = (chord_src + 5) % num_nodes
    src = jnp.concatenate([ring_src, ring_dst, chord_src, chord_dst])
    dst = jnp.concatenate([ring_dst, ring_src, chord_dst, chord_src])
    edge_index = jnp.stack([src, dst], axis=0)          # (2, E)

    a_hat = build_normalized_adjacency(edge_index, num_nodes)
    params = init_params(kp, input_dim, hidden_dim, output_dim)

    out = graph_coloring_forward(a_hat, x, params)
    out = jax.block_until_ready(out)

    ref = reference_forward(a_hat, x, params)           # f32 reference
    assert out.shape == (num_nodes, output_dim)
    # bf16 matmul inputs with f32 accumulation -> loosened tolerance vs. the
    # pure-f32 reference (errors observed ~1e-3..1e-2 at these magnitudes).
    assert jnp.allclose(out, ref, atol=5e-2, rtol=5e-2), "Pallas output mismatch"

    print("KERNEL_OK")
</pallas_src>

<mosaic_0001>
module attributes {stable_mosaic.version = 11 : i64} {
  func.func @gcn_net_kernel(%arg0: memref<128x128xbf16, #tpu.memory_space<vmem>>, %arg1: memref<128x128xbf16, #tpu.memory_space<vmem>>, %arg2: memref<128x128xbf16, #tpu.memory_space<vmem>>, %arg3: memref<1x128xf32, #tpu.memory_space<vmem>>, %arg4: memref<128x128xbf16, #tpu.memory_space<vmem>>, %arg5: memref<1x128xf32, #tpu.memory_space<vmem>>, %arg6: memref<128x128xbf16, #tpu.memory_space<vmem>>, %arg7: memref<1x128xf32, #tpu.memory_space<vmem>>, %arg8: memref<128x128xf32, #tpu.memory_space<vmem>>) attributes {dimension_semantics = [], scalar_prefetch = 0 : i64, scratch_operands = 0 : i64, tpu.core_type = #tpu.core_type<tc>} {
    %c0 = arith.constant 0 : index
    %c0_0 = arith.constant 0 : index
    %0 = vector.load %arg0[%c0, %c0_0] : memref<128x128xbf16, #tpu.memory_space<vmem>>, vector<128x128xbf16>
    %c0_1 = arith.constant 0 : index
    %c0_2 = arith.constant 0 : index
    %1 = vector.load %arg1[%c0_1, %c0_2] : memref<128x128xbf16, #tpu.memory_space<vmem>>, vector<128x128xbf16>
    %c0_3 = arith.constant 0 : index
    %c0_4 = arith.constant 0 : index
    %2 = vector.load %arg2[%c0_3, %c0_4] : memref<128x128xbf16, #tpu.memory_space<vmem>>, vector<128x128xbf16>
    %cst = arith.constant dense<0.000000e+00> : vector<128x128xf32>
    %3 = tpu.matmul %1, %2, %cst {dimension_numbers = #tpu.dot_dimension_numbers<[1], [0], [0], [1], [0, 0, 1, 1], [], []>} : vector<128x128xbf16>, vector<128x128xbf16>, vector<128x128xf32> -> vector<128x128xf32>
    %4 = arith.truncf %3 : vector<128x128xf32> to vector<128x128xbf16>
    %cst_5 = arith.constant dense<0.000000e+00> : vector<128x128xf32>
    %5 = tpu.matmul %0, %4, %cst_5 {dimension_numbers = #tpu.dot_dimension_numbers<[1], [0], [0], [1], [0, 0, 1, 1], [], []>} : vector<128x128xbf16>, vector<128x128xbf16>, vector<128x128xf32> -> vector<128x128xf32>
    %c0_6 = arith.constant 0 : index
    %c0_7 = arith.constant 0 : index
    %6 = vector.load %arg3[%c0_6, %c0_7] : memref<1x128xf32, #tpu.memory_space<vmem>>, vector<1x128xf32>
    %7 = vector.broadcast %6 : vector<1x128xf32> to vector<128x128xf32>
    %8 = arith.addf %5, %7 : vector<128x128xf32>
    %cst_8 = arith.constant 0.000000e+00 : f32
    %9 = vector.broadcast %cst_8 : f32 to vector<128x128xf32>
    %10 = arith.maximumf %8, %9 : vector<128x128xf32>
    %11 = arith.truncf %10 : vector<128x128xf32> to vector<128x128xbf16>
    %c0_9 = arith.constant 0 : index
    %c0_10 = arith.constant 0 : index
    %12 = vector.load %arg4[%c0_9, %c0_10] : memref<128x128xbf16, #tpu.memory_space<vmem>>, vector<128x128xbf16>
    %cst_11 = arith.constant dense<0.000000e+00> : vector<128x128xf32>
    %13 = tpu.matmul %11, %12, %cst_11 {dimension_numbers = #tpu.dot_dimension_numbers<[1], [0], [0], [1], [0, 0, 1, 1], [], []>} : vector<128x128xbf16>, vector<128x128xbf16>, vector<128x128xf32> -> vector<128x128xf32>
    %14 = arith.truncf %13 : vector<128x128xf32> to vector<128x128xbf16>
    %cst_12 = arith.constant dense<0.000000e+00> : vector<128x128xf32>
    %15 = tpu.matmul %0, %14, %cst_12 {dimension_numbers = #tpu.dot_dimension_numbers<[1], [0], [0], [1], [0, 0, 1, 1], [], []>} : vector<128x128xbf16>, vector<128x128xbf16>, vector<128x128xf32> -> vector<128x128xf32>
    %c0_13 = arith.constant 0 : index
    %c0_14 = arith.constant 0 : index
    %16 = vector.load %arg5[%c0_13, %c0_14] : memref<1x128xf32, #tpu.memory_space<vmem>>, vector<1x128xf32>
    %17 = vector.broadcast %16 : vector<1x128xf32> to vector<128x128xf32>
    %18 = arith.addf %15, %17 : vector<128x128xf32>
    %cst_15 = arith.constant 0.000000e+00 : f32
    %19 = vector.broadcast %cst_15 : f32 to vector<128x128xf32>
    %20 = arith.maximumf %18, %19 : vector<128x128xf32>
    %21 = arith.truncf %20 : vector<128x128xf32> to vector<128x128xbf16>
    %c0_16 = arith.constant 0 : index
    %c0_17 = arith.constant 0 : index
    %22 = vector.load %arg6[%c0_16, %c0_17] : memref<128x128xbf16, #tpu.memory_space<vmem>>, vector<128x128xbf16>
    %cst_18 = arith.constant dense<0.000000e+00> : vector<128x128xf32>
    %23 = tpu.matmul %21, %22, %cst_18 {dimension_numbers = #tpu.dot_dimension_numbers<[1], [0], [0], [1], [0, 0, 1, 1], [], []>} : vector<128x128xbf16>, vector<128x128xbf16>, vector<128x128xf32> -> vector<128x128xf32>
    %c0_19 = arith.constant 0 : index
    %c0_20 = arith.constant 0 : index
    %24 = vector.load %arg7[%c0_19, %c0_20] : memref<1x128xf32, #tpu.memory_space<vmem>>, vector<1x128xf32>
    %25 = vector.broadcast %24 : vector<1x128xf32> to vector<128x128xf32>
    %26 = arith.addf %23, %25 : vector<128x128xf32>
    %c0_21 = arith.constant 0 : index
    %c0_22 = arith.constant 0 : index
    %27 = vector.load %arg8[%c0_21, %c0_22] : memref<128x128xf32, #tpu.memory_space<vmem>>, vector<128x128xf32>
    tpu.vector_store %arg8[%c0_21, %c0_22], %26 {strides = array<i32>} : memref<128x128xf32, #tpu.memory_space<vmem>>, vector<128x128xf32>,
    return
  }
}

</mosaic_0001>

<bundles_post_ra>
// kernel: tpu_custom_call.1
= control target key start
LH: loop header
LB: loop body
LE: loop exit
PB: predicated region body
PF: predicated region fallthrough
CT: control target
= control target key end

     0   :  { %13 = vsyncpa [#allocation3], 0  ;;  %s1710_s0 = inlined_call_operand.hbm [shape: bf16[128,128], index: 0, kind: input, shape index: {}]   ;;  %s1711_s1 = inlined_call_operand.hbm [shape: bf16[128,128], index: 1, kind: input, shape index: {}]   ;;  %s1712_s2 = inlined_call_operand.hbm [shape: bf16[128,128], index: 2, kind: input, shape index: {}]   ;;  %s1713_s3 = inlined_call_operand.vmem [shape: f32[1,128], index: 3, kind: input, shape index: {}]   ;;  %s1714_s4 = inlined_call_operand.hbm [shape: bf16[128,128], index: 4, kind: input, shape index: {}]   ;;  %s1715_s5 = inlined_call_operand.vmem [shape: f32[1,128], index: 5, kind: input, shape index: {}]   ;;  %s1716_s6 = inlined_call_operand.hbm [shape: bf16[128,128], index: 6, kind: input, shape index: {}]   ;;  %s1717_s7 = inlined_call_operand.vmem [shape: f32[1,128], index: 7, kind: input, shape index: {}]   ;;  %s1718_s8 = inlined_call_operand.hbm [shape: f32[128,128], index: 8, kind: output, shape index: {}]  }
   0x1   :  { %14 = vsyncpa [#allocation6], 0 }
   0x2   :  { %15 = vsyncpa [#allocation9], 0 }
   0x3   :  { %16 = vsyncpa [#allocation4], 0  ;;  %s1513_s27 = smov [#allocation5]   ;;  %s1514_s29 = smov [#allocation8]  }
   0x4   :  { %s34_s28 = sshll.u32 %s1513_s27, 4  ;;  %s60_s30 = sshll.u32 %s1514_s29, 4  ;;  %s35_s28 = int_to_ptr.vmem [resolvable:$true] %s34_s28  ;;  %s1568_s30 = int_to_ptr.vmem [resolvable:$true] %s60_s30 }
   0x5   :  { %s1373_s11 = scalar_lea.hbm %s1711_s1, 1024 }
   0x6   :  { %p1374_p0 = scmp.ne.s32.totalorder %s1711_s1, %s1373_s11  ;;  %p1377_p1 = scmp.lt.u32.totalorder %s1373_s11, %s1711_s1 }
   0x8   :  { %p1379_p2 = pnand %p1377_p1, %p1374_p0 }
   0xa   :  { %1382 = shalt.err (!%p1379_p2)
}
   0xb   :  { %s1383_s16 = scalar_lea.vmem %s35_s28, 1024  ;;  %p1388_p4 = scmp.lt.s32.totalorder %s35_s28, %s35_s28 }
   0xc   :  { %p1384_p3 = scmp.ne.s32.totalorder %s35_s28, %s1383_s16  ;;  %p1389_p5 = scmp.lt.s32.totalorder %s1383_s16, %s1383_s16 }
   0xe   :  { %p1390_p6 = por %p1389_p5, %p1388_p4 }
  0x10   :  { %p1391_p7 = pnand %p1390_p6, %p1384_p3 }
  0x12   :  { %1394 = shalt.err (!%p1391_p7)
}
  0x13   :  { %s1515_s17 = smov 64   ;;  %s1516_s18 = smov 4  }
  0x14   :  { %40 = dma.hbm_to_vmem [thread:$0]  %s1711_s1, 1024, %s35_s28, [#allocation6], %s1515_s17, %s1515_s17, %s1516_s18  }
  0x15   :  { %s1395_s23 = scalar_lea.hbm %s1714_s4, 1024 }
  0x16   :  { %p1396_p8 = scmp.ne.s32.totalorder %s1714_s4, %s1395_s23  ;;  %p1399_p9 = scmp.lt.u32.totalorder %s1395_s23, %s1714_s4 }
  0x18   :  { %p1401_p10 = pnand %p1399_p9, %p1396_p8 }
  0x1a   :  { %1404 = shalt.err (!%p1401_p10)
}
  0x1b   :  { %s1405_s29 = scalar_lea.vmem %s1568_s30, 1024  ;;  %p1410_p12 = scmp.lt.s32.totalorder %s1568_s30, %s1568_s30 }
  0x1c   :  { %p1406_p11 = scmp.ne.s32.totalorder %s1568_s30, %s1405_s29  ;;  %p1411_p13 = scmp.lt.s32.totalorder %s1405_s29, %s1405_s29 }
  0x1e   :  { %p1412_p0 = por %p1411_p13, %p1410_p12 }
  0x20   :  { %p1413_p1 = pnand %p1412_p0, %p1406_p11 }
  0x22   :  { %1416 = shalt.err (!%p1413_p1)
}
  0x23   :  { %66 = dma.hbm_to_vmem [thread:$0]  %s1714_s4, 1024, %s1568_s30, [#allocation9], %s1515_s17, %s1515_s17, %s1516_s18  }
  0x24   :  { %s1517_s9 = smov [#allocation2]   ;;  %s1518_s11 = smov [#allocation7]  }
  0x25   :  { %s22_s10 = sshll.u32 %s1517_s9, 4  ;;  %s46_s12 = sshll.u32 %s1518_s11, 4  ;;  %s23_s10 = int_to_ptr.vmem [resolvable:$true] %s22_s10  ;;  %s1605_s12 = int_to_ptr.vmem [resolvable:$true] %s46_s12 }
  0x26   :  { %s1417_s15 = scalar_lea.hbm %s1710_s0, 1024 }
  0x27   :  { %p1418_p2 = scmp.ne.s32.totalorder %s1710_s0, %s1417_s15  ;;  %p1421_p3 = scmp.lt.u32.totalorder %s1417_s15, %s1710_s0 }
  0x29   :  { %p1423_p4 = pnand %p1421_p3, %p1418_p2 }
  0x2b   :  { %1426 = shalt.err (!%p1423_p4)
}
  0x2c   :  { %s1427_s4 = scalar_lea.vmem %s23_s10, 1024  ;;  %p1432_p6 = scmp.lt.s32.totalorder %s23_s10, %s23_s10 }
  0x2d   :  { %p1428_p5 = scmp.ne.s32.totalorder %s23_s10, %s1427_s4  ;;  %p1433_p7 = scmp.lt.s32.totalorder %s1427_s4, %s1427_s4 }
  0x2f   :  { %p1434_p8 = por %p1433_p7, %p1432_p6 }
  0x31   :  { %p1435_p9 = pnand %p1434_p8, %p1428_p5 }
  0x33   :  { %1438 = shalt.err (!%p1435_p9)
}
  0x34   :  { %28 = dma.hbm_to_vmem [thread:$0]  %s1710_s0, 1024, %s23_s10, [#allocation3], %s1515_s17, %s1515_s17, %s1516_s18  }
  0x35   :  { %s1439_s25 = scalar_lea.hbm %s1712_s2, 1024 }
  0x36   :  { %p1440_p10 = scmp.ne.s32.totalorder %s1712_s2, %s1439_s25  ;;  %p1443_p11 = scmp.lt.u32.totalorder %s1439_s25, %s1712_s2 }
  0x38   :  { %p1445_p12 = pnand %p1443_p11, %p1440_p10 }
  0x3a   :  { %1448 = shalt.err (!%p1445_p12)
}
  0x3b   :  { %s1449_s28 = scalar_lea.vmem %s1605_s12, 1024  ;;  %p1454_p0 = scmp.lt.s32.totalorder %s1605_s12, %s1605_s12 }
  0x3c   :  { %p1450_p13 = scmp.ne.s32.totalorder %s1605_s12, %s1449_s28  ;;  %p1455_p1 = scmp.lt.s32.totalorder %s1449_s28, %s1449_s28 }
  0x3e   :  { %p1456_p2 = por %p1455_p1, %p1454_p0 }
  0x40   :  { %p1457_p3 = pnand %p1456_p2, %p1450_p13 }
  0x42   :  { %1460 = shalt.err (!%p1457_p3)
}
  0x43   :  { %52 = dma.hbm_to_vmem [thread:$0]  %s1712_s2, 1024, %s1605_s12, [#allocation6], %s1515_s17, %s1515_s17, %s1516_s18  }
  0x44   :  { %s1519_s10 = smov [#allocation10]   ;;  %s1461_s15 = scalar_lea.hbm %s1716_s6, 1024 }
  0x45   :  { %s74_s11 = sshll.u32 %s1519_s10, 4  ;;  %p1462_p4 = scmp.ne.s32.totalorder %s1716_s6, %s1461_s15  ;;  %s75_s11 = int_to_ptr.vmem [resolvable:$true] %s74_s11 }
  0x46   :  { %p1465_p5 = scmp.lt.u32.totalorder %s1461_s15, %s1716_s6 }
  0x48   :  { %p1467_p6 = pnand %p1465_p5, %p1462_p4 }
  0x4a   :  { %1470 = shalt.err (!%p1467_p6)
}
  0x4b   :  { %s1471_s4 = scalar_lea.vmem %s75_s11, 1024  ;;  %p1476_p8 = scmp.lt.s32.totalorder %s75_s11, %s75_s11 }
  0x4c   :  { %p1472_p7 = scmp.ne.s32.totalorder %s75_s11, %s1471_s4  ;;  %p1477_p9 = scmp.lt.s32.totalorder %s1471_s4, %s1471_s4 }
  0x4e   :  { %p1478_p10 = por %p1477_p9, %p1476_p8 }
  0x50   :  { %p1479_p11 = pnand %p1478_p10, %p1472_p7 }
  0x52   :  { %1482 = shalt.err (!%p1479_p11)
}
  0x53   :  { %80 = dma.hbm_to_vmem [thread:$0]  %s1716_s6, 1024, %s75_s11, [#allocation9], %s1515_s17, %s1515_s17, %s1516_s18  }
  0x54   :  { %1505 = dma.done.wait [#allocation3], 1024  }
  0x55   :  { %1506 = vsyncadd [#allocation3], 4294966272 }
  0x56   :  { %1507 = dma.done.wait [#allocation6], 2048  }
  0x57   :  { %1508 = vsyncadd [#allocation6], 4294965248 }
  0x58   :  { %1509 = dma.done.wait [#allocation9], 2048  }
  0x59   :  { %1510 = vsyncadd [#allocation9], 4294965248  ;;  %v1333_v0 = vld [vmem:[#allocation7] sm:$0xff]   ;;  %v1334_v1 = vld [vmem:[#allocation7 + $0x8] sm:$0xff]  }
  0x5a   :  { %1147 = vmatprep.subr.bf16.mxu0 %v1333_v0  ;;  %v1335_v2 = vld [vmem:[#allocation7 + $0x10] sm:$0xff]   ;;  %v1336_v3 = vld [vmem:[#allocation7 + $0x18] sm:$0xff]   ;;  %v1341_v4 = vld [vmem:[#allocation5] sm:$0xff]  }
  0x5b   :  { %1148 = vmatpush3.bf16.msra.mxu0 %v1333_v0  ;;  %1163 = vmatprep.mubr.bf16.mxu0 %v1341_v4  ;;  %v1337_v5 = vld [vmem:[#allocation7 + $0x20] sm:$0xff]   ;;  %v1338_v6 = vld [vmem:[#allocation7 + $0x28] sm:$0xff]   ;;  %v1339_v7 = vld [vmem:[#allocation7 + $0x30] sm:$0xff]  }
  0x5c   :  { %1149 = vmatprep.subr.bf16.mxu0 %v1334_v1  ;;  %v1340_v8 = vld [vmem:[#allocation7 + $0x38] sm:$0xff]   ;;  %v1342_v9 = vld [vmem:[#allocation5 + $0x8] sm:$0xff]   ;;  %v1343_v10 = vld [vmem:[#allocation5 + $0x10] sm:$0xff]  }
  0x5d   :  { %v1344_v11 = vld [vmem:[#allocation5 + $0x18] sm:$0xff]   ;;  %v1345_v12 = vld [vmem:[#allocation5 + $0x20] sm:$0xff]   ;;  %v1346_v13 = vld [vmem:[#allocation5 + $0x28] sm:$0xff]  }
  0x5e   :  { %v1347_v14 = vld [vmem:[#allocation5 + $0x30] sm:$0xff]   ;;  %v1348_v15 = vld [vmem:[#allocation5 + $0x38] sm:$0xff]   ;;  %v1657_v16 = vld [vmem:[#allocation2] sm:$0xff]  }
  0x5f   :  { %1150 = vmatpush3.bf16.msra.mxu0 %v1334_v1  ;;  %1195 = vmatprep.mubr.bf16.mxu1 %v1657_v16  ;;  %v1357_v17 = vld [vmem:[#allocation8] sm:$0xff]   ;;  %v1358_v18 = vld [vmem:[#allocation8 + $0x8] sm:$0xff]   ;;  %v1359_v19 = vld [vmem:[#allocation8 + $0x10] sm:$0xff]  }
  0x60   :  { %1151 = vmatprep.subr.bf16.mxu0 %v1335_v2  ;;  %v1360_v20 = vld [vmem:[#allocation8 + $0x18] sm:$0xff]   ;;  %v1361_v21 = vld [vmem:[#allocation8 + $0x20] sm:$0xff]   ;;  %v1362_v22 = vld [vmem:[#allocation8 + $0x28] sm:$0xff]  }
  0x61   :  { %v1660_v47 = vld [vmem:[#allocation2 + $0x8] sm:$0xff]   ;;  %v1662_v48 = vld [vmem:[#allocation2 + $0x10] sm:$0xff]   ;;  %v1666_v49 = vld [vmem:[#allocation2 + $0x18] sm:$0xff]  }
  0x62   :  { %v1668_v50 = vld [vmem:[#allocation2 + $0x20] sm:$0xff]   ;;  %v1672_v51 = vld [vmem:[#allocation2 + $0x28] sm:$0xff]   ;;  %v1674_v52 = vld [vmem:[#allocation2 + $0x30] sm:$0xff]  }
  0x63   :  { %1152 = vmatpush3.bf16.msra.mxu0 %v1335_v2  ;;  %v1678_v53 = vld [vmem:[#allocation2 + $0x38] sm:$0xff]   ;;  %v1363_v54 = vld [vmem:[#allocation8 + $0x30] sm:$0xff]   ;;  %v1040_v56 = vld [vmem:[%s1713_s3] ss:$0 sm:$0xff] }
  0x64   :  { %1153 = vmatprep.subr.bf16.mxu0 %v1336_v3  ;;  %v1364_v55 = vld [vmem:[#allocation8 + $0x38] sm:$0xff]  }
  0x67   :  { %1154 = vmatpush3.bf16.msra.mxu0 %v1336_v3 }
  0x68   :  { %1155 = vmatprep.subr.bf16.mxu0 %v1337_v5 }
  0x6b   :  { %1156 = vmatpush3.bf16.msra.mxu0 %v1337_v5 }
  0x6c   :  { %1157 = vmatprep.subr.bf16.mxu0 %v1338_v6 }
  0x6f   :  { %1158 = vmatpush3.bf16.msra.mxu0 %v1338_v6 }
  0x70   :  { %1159 = vmatprep.subr.bf16.mxu0 %v1339_v7 }
  0x73   :  { %1160 = vmatpush3.bf16.msra.mxu0 %v1339_v7 }
  0x74   :  { %1161 = vmatprep.subr.bf16.mxu0 %v1340_v8 }
  0x77   :  { %1162 = vmatpush3.bf16.msra.mxu0 %v1340_v8 }
  0x78   :  { %1211 = vmatprep.subr.bf16.mxu0 %v1357_v17 }
  0x7a   :  { %1164 = vmatmul.mubr.bf16.vlgmr.msra.gmra.mrb[0].mxu0 %v1342_v9 }
  0x7b   :  { %1167 = vmatprep.mubr.bf16.mxu0 %v1343_v10  ;;  %1212 = vmatpush3.bf16.msra.mxu0 %v1357_v17 }
  0x7c   :  { %1213 = vmatprep.subr.bf16.mxu0 %v1358_v18 }
  0x7f   :  { %1214 = vmatpush3.bf16.msra.mxu0 %v1358_v18 }
  0x80   :  { %1215 = vmatprep.subr.bf16.mxu0 %v1359_v19 }
  0x82   :  { %1168 = vmatmul.mubr.bf16.gmra.mrb[4].mxu0 %v1344_v11 }
  0x83   :  { %1171 = vmatprep.mubr.bf16.mxu0 %v1345_v12  ;;  %1216 = vmatpush3.bf16.msra.mxu0 %v1359_v19 }
  0x84   :  { %1217 = vmatprep.subr.bf16.mxu0 %v1360_v20 }
  0x87   :  { %1218 = vmatpush3.bf16.msra.mxu0 %v1360_v20 }
  0x88   :  { %1219 = vmatprep.subr.bf16.mxu0 %v1361_v21 }
  0x8a   :  { %1172 = vmatmul.mubr.bf16.gmra.mrb[8].mxu0 %v1346_v13 }
  0x8b   :  { %1175 = vmatprep.mubr.bf16.mxu0 %v1347_v14  ;;  %1220 = vmatpush3.bf16.msra.mxu0 %v1361_v21 }
  0x8c   :  { %1221 = vmatprep.subr.bf16.mxu0 %v1362_v22 }
  0x8f   :  { %1222 = vmatpush3.bf16.msra.mxu0 %v1362_v22 }
  0x90   :  { %1223 = vmatprep.subr.bf16.mxu0 %v1363_v54 }
  0x92   :  { %1176 = vmatmul.mubr.bf16.gmra.mrb[12].mxu0 %v1348_v15 }
  0x93   :  { %1224 = vmatpush3.bf16.msra.mxu0 %v1363_v54 }
  0x94   :  { %1225 = vmatprep.subr.bf16.mxu0 %v1364_v55 }
  0x97   :  { %1226 = vmatpush3.bf16.msra.mxu0 %v1364_v55 }
 0x14d   :  { %v1165_v23 = vpop.f32.mrb[0].mxu0 }
 0x14e   :  { %v277_v24 = vpop.f32.mrb[1].mxu0 }
 0x14f   :  { %v1166_v25 = vpop.f32.mrb[2].mxu0 }
 0x150   :  { %v341_v26 = vpack.c.bf16 %v1166_v25, %v1165_v23  ;;  %v280_v27 = vpop.f32.mrb[3].mxu0 }
 0x151   :  { %v340_v28 = vpack.c.bf16 %v280_v27, %v277_v24 }
 0x153   :  { %1179 = vmatprep.subr.bf16.mxu1 %v340_v28 }
 0x154   :  { %1180 = vmatpush3.bf16.msra.mxu1 %v340_v28 }
 0x155   :  { %v1169_v29 = vpop.f32.mrb[4].mxu0  ;;  %1181 = vmatprep.subr.bf16.mxu1 %v341_v26 }
 0x156   :  { %v293_v30 = vpop.f32.mrb[5].mxu0 }
 0x157   :  { %v1170_v31 = vpop.f32.mrb[6].mxu0 }
 0x158   :  { %v343_v32 = vpack.c.bf16 %v1170_v31, %v1169_v29  ;;  %v296_v33 = vpop.f32.mrb[7].mxu0  ;;  %1182 = vmatpush3.bf16.msra.mxu1 %v341_v26 }
 0x159   :  { %v342_v34 = vpack.c.bf16 %v296_v33, %v293_v30 }
 0x15b   :  { %1183 = vmatprep.subr.bf16.mxu1 %v342_v34 }
 0x15c   :  { %1184 = vmatpush3.bf16.msra.mxu1 %v342_v34 }
 0x15d   :  { %v1173_v35 = vpop.f32.mrb[8].mxu0  ;;  %1185 = vmatprep.subr.bf16.mxu1 %v343_v32 }
 0x15e   :  { %v309_v36 = vpop.f32.mrb[9].mxu0 }
 0x15f   :  { %v1174_v37 = vpop.f32.mrb[10].mxu0 }
 0x160   :  { %v345_v38 = vpack.c.bf16 %v1174_v37, %v1173_v35  ;;  %v312_v39 = vpop.f32.mrb[11].mxu0  ;;  %1186 = vmatpush3.bf16.msra.mxu1 %v343_v32 }
 0x161   :  { %v344_v40 = vpack.c.bf16 %v312_v39, %v309_v36 }
 0x163   :  { %1187 = vmatprep.subr.bf16.mxu1 %v344_v40 }
 0x164   :  { %1188 = vmatpush3.bf16.msra.mxu1 %v344_v40 }
 0x165   :  { %v1177_v41 = vpop.f32.mrb[12].mxu0  ;;  %1189 = vmatprep.subr.bf16.mxu1 %v345_v38 }
 0x166   :  { %v325_v42 = vpop.f32.mrb[13].mxu0 }
 0x167   :  { %v1178_v43 = vpop.f32.mrb[14].mxu0 }
 0x168   :  { %v347_v44 = vpack.c.bf16 %v1178_v43, %v1177_v41  ;;  %v328_v45 = vpop.f32.mrb[15].mxu0  ;;  %1190 = vmatpush3.bf16.msra.mxu1 %v345_v38 }
 0x169   :  { %v346_v46 = vpack.c.bf16 %v328_v45, %v325_v42 }
 0x16b   :  { %1191 = vmatprep.subr.bf16.mxu1 %v346_v46 }
 0x16c   :  { %1192 = vmatpush3.bf16.msra.mxu1 %v346_v46 }
 0x16d   :  { %1193 = vmatprep.subr.bf16.mxu1 %v347_v44 }
 0x170   :  { %1194 = vmatpush3.bf16.msra.mxu1 %v347_v44 }
 0x173   :  { %1196 = vmatmul.mubr.bf16.vlgmr.msra.gmra.mrb[0].mxu1 %v1660_v47 }
 0x174   :  { %1199 = vmatprep.mubr.bf16.mxu1 %v1662_v48 }
 0x17b   :  { %1200 = vmatmul.mubr.bf16.gmra.mrb[4].mxu1 %v1666_v49 }
 0x17c   :  { %1203 = vmatprep.mubr.bf16.mxu1 %v1668_v50 }
 0x183   :  { %1204 = vmatmul.mubr.bf16.gmra.mrb[8].mxu1 %v1672_v51 }
 0x184   :  { %1207 = vmatprep.mubr.bf16.mxu1 %v1674_v52 }
 0x18b   :  { %1208 = vmatmul.mubr.bf16.gmra.mrb[12].mxu1 %v1678_v53 }
 0x18c   :  { %1259 = vmatprep.mubr.bf16.mxu1 %v1657_v16 }
 0x246   :  { %v1197_v57 = vpop.f32.mrb[0].mxu1 }
 0x247   :  { %v446_v58 = vadd.f32 %v1197_v57, %v1040_v56  ;;  %v437_v59 = vpop.f32.mrb[1].mxu1  ;;  %v1365_v57 = vld [vmem:[#allocation10] sm:$0xff]  }
 0x248   :  { %v438_v60 = vadd.f32 %v1040_v56, %v437_v59  ;;  %v1198_v61 = vpop.f32.mrb[2].mxu1  ;;  %1275 = vmatprep.subr.bf16.mxu0 %v1365_v57  ;;  %v1367_v59 = vld [vmem:[#allocation10 + $0x10] sm:$0xff]  }
 0x249   :  { %v449_v62 = vadd.f32 %v1198_v61, %v1040_v56  ;;  %v440_v63 = vpop.f32.mrb[3].mxu1  ;;  %v502_v1 = vmax.f32 %v446_v58, 0.0  ;;  %v1366_v58 = vld [vmem:[#allocation10 + $0x8] sm:$0xff]  }
 0x24a   :  { %v441_v0 = vadd.f32 %v1040_v56, %v440_v63  ;;  %v500_v3 = vmax.f32 %v438_v60, 0.0  ;;  %v1368_v60 = vld [vmem:[#allocation10 + $0x18] sm:$0xff]   ;;  %v1370_v61 = vld [vmem:[#allocation10 + $0x28] sm:$0xff]  }
 0x24b   :  { %v503_v2 = vmax.f32 %v449_v62, 0.0 }
 0x24c   :  { %v501_v4 = vmax.f32 %v441_v0, 0.0 }
 0x24d   :  { %v517_v5 = vpack.c.bf16 %v503_v2, %v502_v1 }
 0x24e   :  { %v516_v6 = vpack.c.bf16 %v501_v4, %v500_v3  ;;  %v1201_v7 = vpop.f32.mrb[4].mxu1 }
 0x24f   :  { %v462_v8 = vadd.f32 %v1201_v7, %v1040_v56  ;;  %v453_v9 = vpop.f32.mrb[5].mxu1 }
 0x250   :  { %v454_v10 = vadd.f32 %v1040_v56, %v453_v9  ;;  %v1202_v11 = vpop.f32.mrb[6].mxu1  ;;  %1227 = vmatprep.mubr.bf16.mxu0 %v516_v6 }
 0x251   :  { %v465_v12 = vadd.f32 %v1202_v11, %v1040_v56  ;;  %v456_v13 = vpop.f32.mrb[7].mxu1  ;;  %1228 = vmatmul.mubr.bf16.vlgmr.msra.gmra.mrb[16].mxu0 %v517_v5  ;;  %v506_v15 = vmax.f32 %v462_v8, 0.0 }
 0x252   :  { %v457_v14 = vadd.f32 %v1040_v56, %v456_v13  ;;  %v504_v17 = vmax.f32 %v454_v10, 0.0  ;;  %1276 = vmatpush3.bf16.msra.mxu0 %v1365_v57 }
 0x253   :  { %v507_v16 = vmax.f32 %v465_v12, 0.0  ;;  %1277 = vmatprep.subr.bf16.mxu0 %v1366_v58 }
 0x254   :  { %v505_v18 = vmax.f32 %v457_v14, 0.0 }
 0x255   :  { %v519_v19 = vpack.c.bf16 %v507_v16, %v506_v15 }
 0x256   :  { %v518_v20 = vpack.c.bf16 %v505_v18, %v504_v17  ;;  %v1205_v21 = vpop.f32.mrb[8].mxu1  ;;  %1278 = vmatpush3.bf16.msra.mxu0 %v1366_v58 }
 0x257   :  { %v478_v22 = vadd.f32 %v1205_v21, %v1040_v56  ;;  %v469_v23 = vpop.f32.mrb[9].mxu1  ;;  %1279 = vmatprep.subr.bf16.mxu0 %v1367_v59 }
 0x258   :  { %v470_v24 = vadd.f32 %v1040_v56, %v469_v23  ;;  %v1206_v25 = vpop.f32.mrb[10].mxu1  ;;  %1231 = vmatprep.mubr.bf16.mxu0 %v518_v20 }
 0x259   :  { %v481_v26 = vadd.f32 %v1206_v25, %v1040_v56  ;;  %v472_v27 = vpop.f32.mrb[11].mxu1  ;;  %1232 = vmatmul.mubr.bf16.gmra.mrb[20].mxu0 %v519_v19  ;;  %v510_v29 = vmax.f32 %v478_v22, 0.0 }
 0x25a   :  { %v473_v28 = vadd.f32 %v1040_v56, %v472_v27  ;;  %v508_v31 = vmax.f32 %v470_v24, 0.0  ;;  %1280 = vmatpush3.bf16.msra.mxu0 %v1367_v59 }
 0x25b   :  { %v511_v30 = vmax.f32 %v481_v26, 0.0  ;;  %1281 = vmatprep.subr.bf16.mxu0 %v1368_v60 }
 0x25c   :  { %v509_v32 = vmax.f32 %v473_v28, 0.0 }
 0x25d   :  { %v521_v33 = vpack.c.bf16 %v511_v30, %v510_v29 }
 0x25e   :  { %v520_v34 = vpack.c.bf16 %v509_v32, %v508_v31  ;;  %v1209_v35 = vpop.f32.mrb[12].mxu1  ;;  %1282 = vmatpush3.bf16.msra.mxu0 %v1368_v60 }
 0x25f   :  { %v494_v36 = vadd.f32 %v1209_v35, %v1040_v56  ;;  %v485_v37 = vpop.f32.mrb[13].mxu1 }
 0x260   :  { %v486_v38 = vadd.f32 %v1040_v56, %v485_v37  ;;  %v1210_v39 = vpop.f32.mrb[14].mxu1  ;;  %1235 = vmatprep.mubr.bf16.mxu0 %v520_v34 }
 0x261   :  { %v497_v40 = vadd.f32 %v1210_v39, %v1040_v56  ;;  %v488_v41 = vpop.f32.mrb[15].mxu1  ;;  %1236 = vmatmul.mubr.bf16.gmra.mrb[24].mxu0 %v521_v33  ;;  %v514_v43 = vmax.f32 %v494_v36, 0.0 }
 0x262   :  { %v489_v42 = vadd.f32 %v1040_v56, %v488_v41  ;;  %v512_v45 = vmax.f32 %v486_v38, 0.0  ;;  %v1369_v56 = vld [vmem:[#allocation10 + $0x20] sm:$0xff]  }
 0x263   :  { %v515_v44 = vmax.f32 %v497_v40, 0.0  ;;  %1283 = vmatprep.subr.bf16.mxu0 %v1369_v56 }
 0x264   :  { %v513_v46 = vmax.f32 %v489_v42, 0.0  ;;  %1284 = vmatpush3.bf16.msra.mxu0 %v1369_v56 }
 0x265   :  { %v523_v54 = vpack.c.bf16 %v515_v44, %v514_v43  ;;  %1285 = vmatprep.subr.bf16.mxu0 %v1370_v61 }
 0x266   :  { %v522_v55 = vpack.c.bf16 %v513_v46, %v512_v45 }
 0x268   :  { %1239 = vmatprep.mubr.bf16.mxu0 %v522_v55  ;;  %1286 = vmatpush3.bf16.msra.mxu0 %v1370_v61 }
 0x269   :  { %1240 = vmatmul.mubr.bf16.gmra.mrb[28].mxu0 %v523_v54 }
 0x324   :  { %v1229_v62 = vpop.f32.mrb[16].mxu0 }
 0x325   :  { %v622_v63 = vpop.f32.mrb[17].mxu0 }
 0x326   :  { %v1230_v0 = vpop.f32.mrb[18].mxu0 }
 0x327   :  { %v686_v1 = vpack.c.bf16 %v1230_v0, %v1229_v62  ;;  %v625_v2 = vpop.f32.mrb[19].mxu0 }
 0x328   :  { %v685_v3 = vpack.c.bf16 %v625_v2, %v622_v63 }
 0x32a   :  { %1243 = vmatprep.subr.bf16.mxu1 %v685_v3 }
 0x32b   :  { %1244 = vmatpush3.bf16.msra.mxu1 %v685_v3 }
 0x32c   :  { %v1233_v4 = vpop.f32.mrb[20].mxu0  ;;  %1245 = vmatprep.subr.bf16.mxu1 %v686_v1 }
 0x32d   :  { %v638_v5 = vpop.f32.mrb[21].mxu0 }
 0x32e   :  { %v1234_v6 = vpop.f32.mrb[22].mxu0 }
 0x32f   :  { %v688_v7 = vpack.c.bf16 %v1234_v6, %v1233_v4  ;;  %v641_v8 = vpop.f32.mrb[23].mxu0  ;;  %1246 = vmatpush3.bf16.msra.mxu1 %v686_v1 }
 0x330   :  { %v687_v9 = vpack.c.bf16 %v641_v8, %v638_v5 }
 0x332   :  { %1247 = vmatprep.subr.bf16.mxu1 %v687_v9 }
 0x333   :  { %1248 = vmatpush3.bf16.msra.mxu1 %v687_v9 }
 0x334   :  { %v1237_v10 = vpop.f32.mrb[24].mxu0  ;;  %1249 = vmatprep.subr.bf16.mxu1 %v688_v7 }
 0x335   :  { %v654_v11 = vpop.f32.mrb[25].mxu0 }
 0x336   :  { %v1238_v12 = vpop.f32.mrb[26].mxu0 }
 0x337   :  { %v690_v13 = vpack.c.bf16 %v1238_v12, %v1237_v10  ;;  %v657_v14 = vpop.f32.mrb[27].mxu0  ;;  %1250 = vmatpush3.bf16.msra.mxu1 %v688_v7 }
 0x338   :  { %v689_v15 = vpack.c.bf16 %v657_v14, %v654_v11 }
 0x33a   :  { %1251 = vmatprep.subr.bf16.mxu1 %v689_v15 }
 0x33b   :  { %1252 = vmatpush3.bf16.msra.mxu1 %v689_v15 }
 0x33c   :  { %v1241_v16 = vpop.f32.mrb[28].mxu0  ;;  %1253 = vmatprep.subr.bf16.mxu1 %v690_v13 }
 0x33d   :  { %v670_v17 = vpop.f32.mrb[29].mxu0 }
 0x33e   :  { %v1242_v18 = vpop.f32.mrb[30].mxu0 }
 0x33f   :  { %v692_v19 = vpack.c.bf16 %v1242_v18, %v1241_v16  ;;  %v673_v20 = vpop.f32.mrb[31].mxu0  ;;  %1254 = vmatpush3.bf16.msra.mxu1 %v690_v13 }
 0x340   :  { %v691_v21 = vpack.c.bf16 %v673_v20, %v670_v17  ;;  %v1058_v17 = vld [vmem:[%s1717_s7] ss:$0 sm:$0xff]  ;;  %s1520_s7 = smov [#allocation11]  }
 0x341   :  { %s1010_s22 = sshll.u32 %s1520_s7, 4  ;;  %s1011_s22 = int_to_ptr.vmem [resolvable:$true] %s1010_s22 }
 0x342   :  { %1255 = vmatprep.subr.bf16.mxu1 %v691_v21  ;;  %s1483_s23 = scalar_lea.vmem %s1011_s22, 2048  ;;  %p1488_p13 = scmp.lt.s32.totalorder %s1011_s22, %s1011_s22 }
 0x343   :  { %1256 = vmatpush3.bf16.msra.mxu1 %v691_v21  ;;  %p1484_p12 = scmp.ne.s32.totalorder %s1011_s22, %s1483_s23  ;;  %p1489_p0 = scmp.lt.s32.totalorder %s1483_s23, %s1483_s23 }
 0x344   :  { %1257 = vmatprep.subr.bf16.mxu1 %v692_v19 }
 0x345   :  { %p1490_p1 = por %p1489_p0, %p1488_p13 }
 0x347   :  { %1258 = vmatpush3.bf16.msra.mxu1 %v692_v19  ;;  %p1491_p2 = pnand %p1490_p1, %p1484_p12 }
 0x348   :  { %1307 = vmatprep.subr.bf16.mxu1 %v1365_v57 }
 0x34a   :  { %1260 = vmatmul.mubr.bf16.vlgmr.msra.gmra.mrb[16].mxu1 %v1660_v47  ;;  %v1371_v47 = vld [vmem:[#allocation10 + $0x30] sm:$0xff]  }
 0x34b   :  { %1263 = vmatprep.mubr.bf16.mxu1 %v1662_v48  ;;  %1315 = vmatpush3.bf16.msra.mxu1 %v1365_v57  ;;  %v1372_v48 = vld [vmem:[#allocation10 + $0x38] sm:$0xff]  }
 0x34c   :  { %1308 = vmatprep.subr.bf16.mxu1 %v1366_v58  ;;  %1287 = vmatprep.subr.bf16.mxu0 %v1371_v47 }
 0x34d   :  { %1288 = vmatpush3.bf16.msra.mxu0 %v1371_v47 }
 0x34e   :  { %1289 = vmatprep.subr.bf16.mxu0 %v1372_v48 }
 0x34f   :  { %1316 = vmatpush3.bf16.msra.mxu1 %v1366_v58 }
 0x350   :  { %1309 = vmatprep.subr.bf16.mxu1 %v1367_v59 }
 0x351   :  { %1290 = vmatpush3.bf16.msra.mxu0 %v1372_v48 }
 0x352   :  { %1264 = vmatmul.mubr.bf16.gmra.mrb[20].mxu1 %v1666_v49  ;;  %v1057_v49 = vld [vmem:[%s1715_s5] ss:$0 sm:$0xff] }
 0x353   :  { %1267 = vmatprep.mubr.bf16.mxu1 %v1668_v50  ;;  %1317 = vmatpush3.bf16.msra.mxu1 %v1367_v59 }
 0x354   :  { %1310 = vmatprep.subr.bf16.mxu1 %v1368_v60 }
 0x357   :  { %1318 = vmatpush3.bf16.msra.mxu1 %v1368_v60 }
 0x358   :  { %1311 = vmatprep.subr.bf16.mxu1 %v1369_v56 }
 0x35a   :  { %1268 = vmatmul.mubr.bf16.gmra.mrb[24].mxu1 %v1672_v51 }
 0x35b   :  { %1271 = vmatprep.mubr.bf16.mxu1 %v1674_v52  ;;  %1319 = vmatpush3.bf16.msra.mxu1 %v1369_v56 }
 0x35c   :  { %1312 = vmatprep.subr.bf16.mxu1 %v1370_v61 }
 0x35f   :  { %1320 = vmatpush3.bf16.msra.mxu1 %v1370_v61 }
 0x360   :  { %1313 = vmatprep.subr.bf16.mxu1 %v1371_v47 }
 0x362   :  { %1272 = vmatmul.mubr.bf16.gmra.mrb[28].mxu1 %v1678_v53 }
 0x363   :  { %1321 = vmatpush3.bf16.msra.mxu1 %v1371_v47 }
 0x364   :  { %1314 = vmatprep.subr.bf16.mxu1 %v1372_v48 }
 0x367   :  { %1322 = vmatpush3.bf16.msra.mxu1 %v1372_v48 }
 0x41d   :  { %v1261_v50 = vpop.f32.mrb[16].mxu1 }
 0x41e   :  { %v743_v51 = vadd.f32 %v1261_v50, %v1057_v49  ;;  %v734_v52 = vpop.f32.mrb[17].mxu1 }
 0x41f   :  { %v735_v22 = vadd.f32 %v1057_v49, %v734_v52  ;;  %v1262_v23 = vpop.f32.mrb[18].mxu1 }
 0x420   :  { %v746_v53 = vadd.f32 %v1262_v23, %v1057_v49  ;;  %v737_v24 = vpop.f32.mrb[19].mxu1  ;;  %v799_v26 = vmax.f32 %v743_v51, 0.0 }
 0x421   :  { %v738_v25 = vadd.f32 %v1057_v49, %v737_v24  ;;  %v797_v28 = vmax.f32 %v735_v22, 0.0 }
 0x422   :  { %v800_v27 = vmax.f32 %v746_v53, 0.0 }
 0x423   :  { %v798_v29 = vmax.f32 %v738_v25, 0.0 }
 0x424   :  { %v814_v30 = vpack.c.bf16 %v800_v27, %v799_v26 }
 0x425   :  { %v813_v31 = vpack.c.bf16 %v798_v29, %v797_v28  ;;  %v1265_v32 = vpop.f32.mrb[20].mxu1 }
 0x426   :  { %v759_v33 = vadd.f32 %v1265_v32, %v1057_v49  ;;  %v750_v34 = vpop.f32.mrb[21].mxu1 }
 0x427   :  { %v751_v35 = vadd.f32 %v1057_v49, %v750_v34  ;;  %v1266_v36 = vpop.f32.mrb[22].mxu1  ;;  %1291 = vmatprep.mubr.bf16.mxu0 %v813_v31 }
 0x428   :  { %v762_v37 = vadd.f32 %v1266_v36, %v1057_v49  ;;  %v753_v38 = vpop.f32.mrb[23].mxu1  ;;  %1292 = vmatmul.mubr.bf16.vlgmr.msra.gmra.mrb[32].mxu0 %v814_v30  ;;  %v803_v40 = vmax.f32 %v759_v33, 0.0 }
 0x429   :  { %v754_v39 = vadd.f32 %v1057_v49, %v753_v38  ;;  %v801_v42 = vmax.f32 %v751_v35, 0.0 }
 0x42a   :  { %v804_v41 = vmax.f32 %v762_v37, 0.0 }
 0x42b   :  { %v802_v43 = vmax.f32 %v754_v39, 0.0 }
 0x42c   :  { %v816_v44 = vpack.c.bf16 %v804_v41, %v803_v40 }
 0x42d   :  { %v815_v45 = vpack.c.bf16 %v802_v43, %v801_v42  ;;  %v1269_v46 = vpop.f32.mrb[24].mxu1 }
 0x42e   :  { %v775_v54 = vadd.f32 %v1269_v46, %v1057_v49  ;;  %v766_v55 = vpop.f32.mrb[25].mxu1 }
 0x42f   :  { %v767_v57 = vadd.f32 %v1057_v49, %v766_v55  ;;  %v1270_v58 = vpop.f32.mrb[26].mxu1  ;;  %1295 = vmatprep.mubr.bf16.mxu0 %v815_v45 }
 0x430   :  { %v778_v59 = vadd.f32 %v1270_v58, %v1057_v49  ;;  %v769_v60 = vpop.f32.mrb[27].mxu1  ;;  %1296 = vmatmul.mubr.bf16.gmra.mrb[36].mxu0 %v816_v44  ;;  %v807_v61 = vmax.f32 %v775_v54, 0.0 }
 0x431   :  { %v770_v56 = vadd.f32 %v1057_v49, %v769_v60  ;;  %v805_v63 = vmax.f32 %v767_v57, 0.0 }
 0x432   :  { %v808_v62 = vmax.f32 %v778_v59, 0.0 }
 0x433   :  { %v806_v0 = vmax.f32 %v770_v56, 0.0 }
 0x434   :  { %v818_v1 = vpack.c.bf16 %v808_v62, %v807_v61 }
 0x435   :  { %v817_v2 = vpack.c.bf16 %v806_v0, %v805_v63  ;;  %v1273_v3 = vpop.f32.mrb[28].mxu1 }
 0x436   :  { %v791_v4 = vadd.f32 %v1273_v3, %v1057_v49  ;;  %v782_v5 = vpop.f32.mrb[29].mxu1 }
 0x437   :  { %v783_v6 = vadd.f32 %v1057_v49, %v782_v5  ;;  %v1274_v7 = vpop.f32.mrb[30].mxu1  ;;  %1299 = vmatprep.mubr.bf16.mxu1 %v817_v2 }
 0x438   :  { %v794_v8 = vadd.f32 %v1274_v7, %v1057_v49  ;;  %v785_v9 = vpop.f32.mrb[31].mxu1  ;;  %1300 = vmatmul.mubr.bf16.vlgmr.msra.gmra.mrb[32].mxu1 %v818_v1  ;;  %v811_v11 = vmax.f32 %v791_v4, 0.0 }
 0x439   :  { %v786_v10 = vadd.f32 %v1057_v49, %v785_v9  ;;  %v809_v13 = vmax.f32 %v783_v6, 0.0 }
 0x43a   :  { %v812_v12 = vmax.f32 %v794_v8, 0.0 }
 0x43b   :  { %v810_v14 = vmax.f32 %v786_v10, 0.0 }
 0x43c   :  { %v820_v15 = vpack.c.bf16 %v812_v12, %v811_v11 }
 0x43d   :  { %v819_v16 = vpack.c.bf16 %v810_v14, %v809_v13 }
 0x43f   :  { %1303 = vmatprep.mubr.bf16.mxu1 %v819_v16 }
 0x440   :  { %1304 = vmatmul.mubr.bf16.gmra.mrb[36].mxu1 %v820_v15 }
 0x4fb   :  { %v1293_v18 = vpop.f32.mrb[32].mxu0 }
 0x4fc   :  { %v935_v19 = vadd.f32 %v1293_v18, %v1058_v17  ;;  %v926_v20 = vpop.f32.mrb[33].mxu0 }
 0x4fd   :  { %v927_v21 = vadd.f32 %v1058_v17, %v926_v20  ;;  %v1294_v47 = vpop.f32.mrb[34].mxu0 }
 0x4fe   :  { %991 = vst [vmem:[#allocation11 + $0x10] sm:$0xff] %v935_v19  ;;  %v938_v48 = vadd.f32 %v1294_v47, %v1058_v17  ;;  %v929_v49 = vpop.f32.mrb[35].mxu0 }
 0x4ff   :  { %989 = vst [vmem:[#allocation11] sm:$0xff] %v927_v21  ;;  %v930_v50 = vadd.f32 %v1058_v17, %v929_v49 }
 0x500   :  { %992 = vst [vmem:[#allocation11 + $0x18] sm:$0xff] %v938_v48 }
 0x501   :  { %990 = vst [vmem:[#allocation11 + $0x8] sm:$0xff] %v930_v50 }
 0x503   :  { %v1297_v51 = vpop.f32.mrb[36].mxu0 }
 0x504   :  { %v951_v52 = vadd.f32 %v1297_v51, %v1058_v17  ;;  %v942_v22 = vpop.f32.mrb[37].mxu0 }
 0x505   :  { %v943_v23 = vadd.f32 %v1058_v17, %v942_v22  ;;  %v1298_v53 = vpop.f32.mrb[38].mxu0 }
 0x506   :  { %995 = vst [vmem:[#allocation11 + $0x30] sm:$0xff] %v951_v52  ;;  %v954_v24 = vadd.f32 %v1298_v53, %v1058_v17  ;;  %v945_v25 = vpop.f32.mrb[39].mxu0 }
 0x507   :  { %993 = vst [vmem:[#allocation11 + $0x20] sm:$0xff] %v943_v23  ;;  %v946_v26 = vadd.f32 %v1058_v17, %v945_v25 }
 0x508   :  { %996 = vst [vmem:[#allocation11 + $0x38] sm:$0xff] %v954_v24 }
 0x509   :  { %994 = vst [vmem:[#allocation11 + $0x28] sm:$0xff] %v946_v26 }
 0x50b   :  { %v1301_v27 = vpop.f32.mrb[32].mxu1 }
 0x50c   :  { %v967_v28 = vadd.f32 %v1301_v27, %v1058_v17  ;;  %v958_v29 = vpop.f32.mrb[33].mxu1 }
 0x50d   :  { %v959_v30 = vadd.f32 %v1058_v17, %v958_v29  ;;  %v1302_v31 = vpop.f32.mrb[34].mxu1 }
 0x50e   :  { %999 = vst [vmem:[#allocation11 + $0x50] sm:$0xff] %v967_v28  ;;  %v970_v32 = vadd.f32 %v1302_v31, %v1058_v17  ;;  %v961_v33 = vpop.f32.mrb[35].mxu1 }
 0x50f   :  { %997 = vst [vmem:[#allocation11 + $0x40] sm:$0xff] %v959_v30  ;;  %v962_v34 = vadd.f32 %v1058_v17, %v961_v33 }
 0x510   :  { %1000 = vst [vmem:[#allocation11 + $0x58] sm:$0xff] %v970_v32 }
 0x511   :  { %998 = vst [vmem:[#allocation11 + $0x48] sm:$0xff] %v962_v34 }
 0x513   :  { %v1305_v35 = vpop.f32.mrb[36].mxu1 }
 0x514   :  { %v983_v36 = vadd.f32 %v1305_v35, %v1058_v17  ;;  %v974_v37 = vpop.f32.mrb[37].mxu1 }
 0x515   :  { %v975_v38 = vadd.f32 %v1058_v17, %v974_v37  ;;  %v1306_v39 = vpop.f32.mrb[38].mxu1 }
 0x516   :  { %1003 = vst [vmem:[#allocation11 + $0x70] sm:$0xff] %v983_v36  ;;  %v986_v40 = vadd.f32 %v1306_v39, %v1058_v17  ;;  %v977_v41 = vpop.f32.mrb[39].mxu1 }
 0x517   :  { %1001 = vst [vmem:[#allocation11 + $0x60] sm:$0xff] %v975_v38  ;;  %v978_v42 = vadd.f32 %v1058_v17, %v977_v41 }
 0x518   :  { %1004 = vst [vmem:[#allocation11 + $0x78] sm:$0xff] %v986_v40 }
 0x519   :  { %1002 = vst [vmem:[#allocation11 + $0x68] sm:$0xff] %v978_v42 }
 0x51a   :  { %1494 = shalt.err (!%p1491_p2)
}
 0x51b   :  { %s1495_s26 = scalar_lea.hbm %s1718_s8, 2048 }
 0x51c   :  { %p1496_p3 = scmp.ne.s32.totalorder %s1718_s8, %s1495_s26  ;;  %p1499_p4 = scmp.lt.u32.totalorder %s1495_s26, %s1718_s8 }
 0x51e   :  { %p1501_p5 = pnand %p1499_p4, %p1496_p3 }
 0x520   :  { %1504 = shalt.err (!%p1501_p5)
}
 0x521   :  { %s1521_s0 = smov 128   ;;  %s1522_s9 = smov 8  }
 0x522   :  { %1016 = dma.vmem_to_hbm [thread:$0]  %s1011_s22, 2048, %s1718_s8, [#allocation4], %s1521_s0, %s1521_s0, %s1522_s9  }
 0x523   :  { %1511 = dma.done.wait [#allocation4], 2048  }
 0x524   :  { %1512 = vsyncadd [#allocation4], 4294965248 }
 0x525   :  { %1020 = vsyncpa [#allocation3], 1 }
 0x526   :  { %1021 = vsyncpa [#allocation6], 1 }
 0x527   :  { %1022 = vsyncpa [#allocation9], 1 }
 0x528   :  { %1023 = vsyncpa [#allocation4], 1 }

</bundles_post_ra>
